<compile_context>
chip_gen: v7x
topology: tpu7x:2x2x1
jax: 0.10.0
libtpu: 0.0.40
codegen_flags: <defaults>
</compile_context>

<pallas_src>
import jax
import jax.numpy as jnp
from jax.experimental import pallas as pl
from jax.experimental.pallas import tpu as pltpu


def _mlp_kernel(x_ref, params_ref, o_ref):
    # x_ref:      (1, bb)  batch block on the lane axis (lane-dense load)
    # params_ref: (H, 4)   columns = [fc1.w, fc1.b, fc3.w, fc3.b (row 0 only)]
    # o_ref:      (1, bb)  batch block on the lane axis (lane-dense store)
    x = x_ref[...]                                   # (1, bb)
    w1 = params_ref[:, 0:1]                          # (H, 1)
    b1 = params_ref[:, 1:2]                          # (H, 1)
    w2 = params_ref[:, 2:3]                          # (H, 1)
    b2 = params_ref[0:1, 3:4]                        # (1, 1) -- only row 0 is real

    # fc1: K=1 contraction == outer product -> plain VPU broadcast multiply-add.
    # x is consumed exactly once here, so exactly one (H, bb) broadcast is
    # materialized (nothing for the compiler to re-emit per use).
    z = w1 * x + b1                                  # (H, bb)

    # Exact sigmoid via a single EUP tanh push (separate VLIW slot -> free).
    h = 0.5 * jnp.tanh(0.5 * z) + 0.5                # (H, bb)

    # fc3: N=1 contraction == weighted sublane reduction on the XLU.
    # TODO(synk): route this through jnp.dot on the MXU if H is ever >= 256.
    y = jnp.sum(w2 * h, axis=0, keepdims=True)       # (1, bb)
    o_ref[...] = (y + b2).astype(o_ref.dtype)


def pack_params(w1, b1, w2, b2):
    """Pack (fc1.weight, fc1.bias, fc3.weight, fc3.bias) into one (H, 4) slab.

    Call ONCE at init / after a parameter update -- NOT in the forward path.
    Only degenerate-dim reshapes are used, so element order is unchanged.
    """
    H = w1.shape[0]
    b2_col = jnp.zeros((H, 1), jnp.float32).at[0, 0].set(
        b2.reshape(()).astype(jnp.float32))          # fc3.bias lives at params[0, 3]
    return jnp.concatenate(
        [
            w1.reshape(H, 1).astype(jnp.float32),    # fc1.weight (H, 1)
            b1.reshape(H, 1).astype(jnp.float32),    # fc1.bias   (H,)
            w2.reshape(H, 1).astype(jnp.float32),    # fc3.weight (1, H)
            b2_col,                                  # fc3.bias   (1,)
        ],
        axis=1,
    )


@jax.jit
def ournet_forward(x, params):
    """Pallas equivalent of OurNet.forward.

    x      : (B, 1) float32
    params : (H, 4) float32 slab from pack_params()
    returns (B, 1) float32
    """
    B = x.shape[0]
    H = params.shape[0]

    # Lane-dense layout: batch on the 128-wide lane axis.  Degenerate-dim
    # reshape only (no transpose) -> no data movement.
    x_row = x.reshape(1, B).astype(jnp.float32)

    # Tile the batch over a "parallel" grid when it is large; block last dim is
    # either the full B (always legal) or a 128-multiple (512) for unmasked vst.
    bb = 512 if (B % 512 == 0) else B
    nb = B // bb

    y_row = pl.pallas_call(
        _mlp_kernel,
        out_shape=jax.ShapeDtypeStruct((1, B), jnp.float32),
        grid=(nb,),
        in_specs=[
            pl.BlockSpec((1, bb), lambda i: (0, i)),   # x: lane-dense batch blocks
            pl.BlockSpec((H, 4), lambda i: (0, 0)),    # params: resident every step
        ],
        out_specs=pl.BlockSpec((1, bb), lambda i: (0, i)),
        compiler_params=pltpu.CompilerParams(
            # v7x: parallel batch axis shards across both TensorCores;
            # harmless on single-TC v5e/v6e.
            dimension_semantics=("parallel",),
        ),
        cost_estimate=pl.CostEstimate(
            flops=4 * B * H,                 # fc1 FMA + fc3 FMA
            transcendentals=B * H,           # one tanh per hidden activation
            bytes_accessed=4 * (2 * B + 4 * H),
        ),
    )(x_row, params)

    # Restore the PyTorch (B, 1) output shape (degenerate-dim reshape, free).
    return y_row.reshape(B, 1)


def _reference(x, w1, b1, w2, b2):
    h = jax.nn.sigmoid(x @ w1.T + b1)
    return h @ w2.T + b2


if __name__ == "__main__":
    key = jax.random.PRNGKey(0)
    k_x, k_w1, k_b1, k_w2, k_b2 = jax.random.split(key, 5)

    B = 8        # batch
    H = 32       # n_hid_n

    x = jax.random.normal(k_x, (B, 1), dtype=jnp.float32)
    w1 = jax.random.uniform(k_w1, (H, 1), minval=-1.0, maxval=1.0, dtype=jnp.float32)
    b1 = jax.random.uniform(k_b1, (H,), minval=-1.0, maxval=1.0, dtype=jnp.float32)
    bound2 = 1.0 / (H ** 0.5)
    w2 = jax.random.uniform(k_w2, (1, H), minval=-bound2, maxval=bound2, dtype=jnp.float32)
    b2 = jax.random.uniform(k_b2, (1,), minval=-bound2, maxval=bound2, dtype=jnp.float32)

    # Pack parameters ONCE (outside the forward path).
    params = pack_params(w1, b1, w2, b2)

    out = jax.block_until_ready(ournet_forward(x, params))

    ref = _reference(x, w1, b1, w2, b2)
    assert out.shape == (B, 1)
    # Exact tanh-based sigmoid -> tight tolerance again.
    assert jnp.allclose(out, ref, atol=1e-5, rtol=1e-5)

    print("KERNEL_OK")
</pallas_src>

<mosaic_0001>
module attributes {stable_mosaic.version = 11 : i64} {
  func.func @_mlp_kernel(%arg0: i32, %arg1: memref<1x8xf32, #tpu.memory_space<vmem>>, %arg2: memref<32x4xf32, #tpu.memory_space<vmem>>, %arg3: memref<1x8xf32, #tpu.memory_space<vmem>>) attributes {dimension_semantics = [#tpu.dimension_semantics<parallel>], iteration_bounds = array<i64: 1>, scalar_prefetch = 0 : i64, scratch_operands = 0 : i64, tpu.core_type = #tpu.core_type<tc>, window_params = [{transform_indices = @transform_0, window_bounds = array<i64: 1, 8>}, {pipeline_mode = #tpu.pipeline_mode<synchronous>, transform_indices = @transform_1, window_bounds = array<i64: 32, 4>}, {transform_indices = @transform_2, window_bounds = array<i64: 1, 8>}]} {
    %c0 = arith.constant 0 : index
    %c0_0 = arith.constant 0 : index
    %0 = vector.load %arg1[%c0, %c0_0] : memref<1x8xf32, #tpu.memory_space<vmem>>, vector<1x8xf32>
    %c0_1 = arith.constant 0 : index
    %c0_2 = arith.constant 0 : index
    %1 = vector.load %arg2[%c0_1, %c0_2] : memref<32x4xf32, #tpu.memory_space<vmem>>, vector<32x1xf32>
    %c0_3 = arith.constant 0 : index
    %c1 = arith.constant 1 : index
    %2 = vector.load %arg2[%c0_3, %c1] : memref<32x4xf32, #tpu.memory_space<vmem>>, vector<32x1xf32>
    %c0_4 = arith.constant 0 : index
    %c2 = arith.constant 2 : index
    %3 = vector.load %arg2[%c0_4, %c2] : memref<32x4xf32, #tpu.memory_space<vmem>>, vector<32x1xf32>
    %c0_5 = arith.constant 0 : index
    %c3 = arith.constant 3 : index
    %4 = vector.load %arg2[%c0_5, %c3] : memref<32x4xf32, #tpu.memory_space<vmem>>, vector<1x1xf32>
    %5 = vector.broadcast %1 : vector<32x1xf32> to vector<32x8xf32>
    %6 = vector.broadcast %0 : vector<1x8xf32> to vector<32x8xf32>
    %7 = arith.mulf %5, %6 : vector<32x8xf32>
    %8 = vector.broadcast %2 : vector<32x1xf32> to vector<32x8xf32>
    %9 = arith.addf %7, %8 : vector<32x8xf32>
    %cst = arith.constant 5.000000e-01 : f32
    %10 = vector.broadcast %cst : f32 to vector<32x8xf32>
    %11 = arith.mulf %10, %9 : vector<32x8xf32>
    %12 = math.tanh %11 : vector<32x8xf32>
    %cst_6 = arith.constant 5.000000e-01 : f32
    %13 = vector.broadcast %cst_6 : f32 to vector<32x8xf32>
    %14 = arith.mulf %13, %12 : vector<32x8xf32>
    %cst_7 = arith.constant 5.000000e-01 : f32
    %15 = vector.broadcast %cst_7 : f32 to vector<32x8xf32>
    %16 = arith.addf %14, %15 : vector<32x8xf32>
    %17 = vector.broadcast %3 : vector<32x1xf32> to vector<32x8xf32>
    %18 = arith.mulf %17, %16 : vector<32x8xf32>
    %cst_8 = arith.constant dense<0.000000e+00> : vector<8xf32>
    %19 = vector.multi_reduction <add>, %18, %cst_8 [0] : vector<32x8xf32> to vector<8xf32>
    %20 = vector.shape_cast %19 : vector<8xf32> to vector<1x8xf32>
    %21 = vector.broadcast %4 : vector<1x1xf32> to vector<1x8xf32>
    %22 = arith.addf %20, %21 : vector<1x8xf32>
    %c0_9 = arith.constant 0 : index
    %c0_10 = arith.constant 0 : index
    %23 = vector.load %arg3[%c0_9, %c0_10] : memref<1x8xf32, #tpu.memory_space<vmem>>, vector<1x8xf32>
    tpu.vector_store %arg3[%c0_9, %c0_10], %22 {strides = array<i32>} : memref<1x8xf32, #tpu.memory_space<vmem>>, vector<1x8xf32>,
    return
  }
  func.func @transform_0(%arg0: i32) -> (i32, i32) {
    %c0_i32 = arith.constant 0 : i32
    %c0_i32_0 = arith.constant 0 : i32
    return %c0_i32, %arg0 : i32, i32
  }
  func.func @transform_1(%arg0: i32) -> (i32, i32) {
    %c0_i32 = arith.constant 0 : i32
    %c0_i32_0 = arith.constant 0 : i32
    %c0_i32_1 = arith.constant 0 : i32
    return %c0_i32, %c0_i32_0 : i32, i32
  }
  func.func @transform_2(%arg0: i32) -> (i32, i32) {
    %c0_i32 = arith.constant 0 : i32
    %c0_i32_0 = arith.constant 0 : i32
    return %c0_i32, %arg0 : i32, i32
  }
}

</mosaic_0001>

<bundles_post_ra>
// kernel: ournet_forward.1
= control target key start
LH: loop header
LB: loop body
LE: loop exit
PB: predicated region body
PF: predicated region fallthrough
CT: control target
= control target key end

     0   :  { %v187_v2 = vmov 0   ;;  %s237_s0 = inlined_call_operand.vmem [shape: f32[1,8], index: 0, kind: input, shape index: {}]   ;;  %s238_s1 = inlined_call_operand.vmem [shape: f32[32,4], index: 1, kind: input, shape index: {}]   ;;  %s239_s2 = inlined_call_operand.hbm [shape: f32[1,8], index: 2, kind: output, shape index: {}]  }
   0x1   :  { %v15_v0 = vld [vmem:[%s238_s1 + $0x10] sm:$0xff]  ;;  %v13_v1 = vld [vmem:[%s238_s1] sm:$0xff]  ;;  %147 = vset.pattern.permute.xlu1 %v187_v2  ;;  %146 = vset.pattern.permute.xlu0 %v187_v2 }
   0x2   :  { %30 = vperm.xlu1 %147, %v15_v0   ;;  %20 = vperm.xlu0 %146, %v13_v1  }
   0x3   :  { %7 = vsyncpa [#allocation3], 0  ;;  %v14_v3 = vld [vmem:[%s238_s1 + $0x8] sm:$0xff]  ;;  %v188_v4 = vmov 1   ;;  %v16_v5 = vld [vmem:[%s238_s1 + $0x18] sm:$0xff]  ;;  %v189_v6 = vmov 2  }
   0x4   :  { %v17_v7 = vld [vmem:[%s238_s1] sm:$0x1]  ;;  %v190_v8 = vmov 3   ;;  %vm104_vm0 = vcmask 64512   ;;  %vm124_vm1 = vcmask 57344  }
   0x5   :  { %v140_v11 = vld [vmem:[%s237_s0] ss:$0 sm:$0xff]  ;;  %s191_s0 = smov [#allocation2]  }
   0x6   :  { %148 = vset.pattern.permute.xlu1 %v188_v4  ;;  %25 = vperm.xlu0 %146, %v14_v3   ;;  %s132_s1 = sshll.u32 %s191_s0, 4  ;;  %s133_s1 = int_to_ptr.vmem [resolvable:$true] %s132_s1 }
   0x7   :  { %49 = vperm.xlu1 %148, %v13_v1   ;;  %s163_s21 = scalar_lea.vmem %s133_s1, 16  ;;  %s167_s22 = scalar_lea.vmem %s133_s1, 32 }
   0x8   :  { %p164_p0 = scmp.ne.s32.totalorder %s133_s1, %s163_s21  ;;  %p168_p1 = scmp.lt.s32.totalorder %s133_s1, %s133_s1 }
   0x9   :  { %p169_p2 = scmp.lt.s32.totalorder %s167_s22, %s163_s21 }
   0xa   :  { %149 = vset.pattern.permute.xlu0 %v188_v4 }
   0xb   :  { %150 = vset.pattern.permute.xlu1 %v187_v2  ;;  %53 = vperm.xlu0 %149, %v14_v3   ;;  %p170_p3 = por %p169_p2, %p168_p1 }
   0xc   :  { %35 = vperm.xlu1 %150, %v16_v5  }
   0xd   :  { %p171_p4 = pnand %p170_p3, %p164_p0 }
   0xf   :  { %61 = vperm.xlu0 %149, %v16_v5  }
  0x10   :  { %151 = vset.pattern.permute.xlu1 %v188_v4 }
  0x11   :  { %57 = vperm.xlu1 %151, %v15_v0  }
  0x13   :  { %153 = vset.pattern.permute.xlu0 %v189_v6 }
  0x14   :  { %89 = vperm.xlu0 %153, %v14_v3  }
  0x15   :  { %152 = vset.pattern.permute.xlu1 %v189_v6 }
  0x16   :  { %85 = vperm.xlu1 %152, %v13_v1  }
  0x18   :  { %154 = vset.pattern.permute.xlu0 %v190_v8 }
  0x19   :  { %120 = vperm.xlu0 %154, %v17_v7  }
  0x1a   :  { %93 = vperm.xlu1 %152, %v15_v0  }
  0x1e   :  { %97 = vperm.xlu1 %152, %v16_v5  }
  0x81   :  { %v31_v9 = vpop.permute.xlu1 %30  ;;  %v21_v10 = vpop.permute.xlu0 %20 }
  0x82   :  { %v44_v12 = vmul.f32 %v140_v11, %v21_v10  ;;  %v46_v24 = vmul.f32 %v140_v11, %v31_v9 }
  0x85   :  { %v26_v13 = vpop.permute.xlu0 %25 }
  0x86   :  { %v50_v14 = vpop.permute.xlu1 %49  ;;  %v45_v16 = vmul.f32 %v140_v11, %v26_v13 }
  0x87   :  { %v64_v15 = vadd.f32 %v50_v14, %v44_v12 }
  0x89   :  { %v68_v17 = vmul.f32 0.5, %v64_v15 }
  0x8a   :  { %v54_v18 = vpop.permute.xlu0 %53 }
  0x8b   :  { %155 = vtanh.f32 %v68_v17  ;;  %v65_v19 = vadd.f32 %v54_v18, %v45_v16  ;;  %v36_v20 = vpop.permute.xlu1 %35 }
  0x8c   :  { %v47_v21 = vmul.f32 %v140_v11, %v36_v20 }
  0x8d   :  { %v69_v22 = vmul.f32 0.5, %v65_v19 }
  0x8e   :  { %v62_v23 = vpop.permute.xlu0 %61 }
  0x8f   :  { %157 = vtanh.f32 %v69_v22  ;;  %v67_v25 = vadd.f32 %v62_v23, %v47_v21 }
  0x90   :  { %v58_v26 = vpop.permute.xlu1 %57 }
  0x91   :  { %v71_v27 = vmul.f32 0.5, %v67_v25  ;;  %v66_v28 = vadd.f32 %v58_v26, %v46_v24 }
  0x93   :  { %159 = vtanh.f32 %v71_v27  ;;  %v70_v29 = vmul.f32 0.5, %v66_v28  ;;  %v90_v35 = vpop.permute.xlu0 %89 }
  0x95   :  { %v156_v30 = vpop.eup %155  ;;  %161 = vtanh.f32 %v70_v29  ;;  %v86_v31 = vpop.permute.xlu1 %85 }
  0x96   :  { %v76_v32 = vmul.f32 0.5, %v156_v30 }
  0x98   :  { %v80_v36 = vadd.f32 0.5, %v76_v32  ;;  %v121_v62 = vpop.permute.xlu0 %120 }
  0x99   :  { %v158_v33 = vpop.eup %157  ;;  %v94_v39 = vpop.permute.xlu1 %93 }
  0x9a   :  { %v77_v34 = vmul.f32 0.5, %v158_v33  ;;  %v100_v43 = vmul.f32 %v86_v31, %v80_v36 }
  0x9c   :  { %v81_v37 = vadd.f32 0.5, %v77_v34  ;;  %v105_v49 = vsel %vm104_vm0, %v100_v43, 0.0 }
  0x9d   :  { %v160_v38 = vpop.eup %159  ;;  %v98_v48 = vpop.permute.xlu1 %97 }
  0x9e   :  { %v79_v40 = vmul.f32 0.5, %v160_v38  ;;  %v101_v41 = vmul.f32 %v90_v35, %v81_v37 }
  0x9f   :  { %v162_v42 = vpop.eup %161 }
  0xa0   :  { %v78_v44 = vmul.f32 0.5, %v162_v42  ;;  %v83_v45 = vadd.f32 0.5, %v79_v40  ;;  %v106_v47 = vsel %vm104_vm0, %v101_v41, 0.0 }
  0xa1   :  { %v107_v52 = vadd.f32 %v106_v47, %v105_v49 }
  0xa2   :  { %v82_v46 = vadd.f32 0.5, %v78_v44  ;;  %v103_v51 = vmul.f32 %v98_v48, %v83_v45 }
  0xa4   :  { %v102_v50 = vmul.f32 %v94_v39, %v82_v46  ;;  %v110_v55 = vsel %vm104_vm0, %v103_v51, 0.0 }
  0xa6   :  { %v108_v53 = vsel %vm104_vm0, %v102_v50, 0.0 }
  0xa7   :  { %v109_v54 = vadd.f32 %v108_v53, %v107_v52 }
  0xa9   :  { %v111_v56 = vadd.f32 %v110_v55, %v109_v54 }
  0xab   :  { %v112_v57 = vrot.slane %v111_v56, 4 }
  0xad   :  { %v113_v58 = vadd.f32 %v112_v57, %v111_v56 }
  0xaf   :  { %v114_v59 = vrot.slane %v113_v58, 2 }
  0xb1   :  { %v115_v60 = vadd.f32 %v114_v59, %v113_v58 }
  0xb3   :  { %v116_v61 = vrot.slane %v115_v60, 1 }
  0xb5   :  { %v117_v63 = vadd.f32 %v116_v61, %v115_v60 }
  0xb7   :  { %v123_v0 = vadd.f32 %v121_v62, %v117_v63 }
  0xb9   :  { %125 = vst.msk [vmem:[#allocation2] sm:$0x1] %vm124_vm1, %v123_v0 }
  0xba   :  { %174 = shalt.err (!%p171_p4)
}
  0xbb   :  { %s175_s25 = scalar_lea.hbm %s239_s2, 16 }
  0xbc   :  { %p176_p5 = scmp.ne.s32.totalorder %s239_s2, %s175_s25  ;;  %p179_p6 = scmp.lt.u32.totalorder %s175_s25, %s239_s2 }
  0xbe   :  { %p181_p7 = pnand %p179_p6, %p176_p5 }
  0xc0   :  { %184 = shalt.err (!%p181_p7)
}
  0xc1   :  { %135 = dma.vmem_to_hbm [thread:$0]  %s133_s1, 16, %s239_s2, [#allocation3]  }
  0xc2   :  { %185 = dma.done.wait [#allocation3], 16  }
  0xc3   :  { %186 = vsyncadd [#allocation3], 4294967280 }
  0xc4   :  { %139 = vsyncpa [#allocation3], 1 }

</bundles_post_ra>
